<compile_context>
chip_gen: v7x
topology: tpu7x:2x2x1
jax: 0.10.0
libtpu: 0.0.40
codegen_flags: <defaults>
</compile_context>

<pallas_src>
import functools

import jax
import jax.numpy as jnp
from jax import lax
from jax.experimental import pallas as pl
from jax.experimental.pallas import tpu as pltpu


def _round_up(x, m):
    return (x + m - 1) // m * m


def _honest_vmem_estimate(block_n, npad, n_tiles, d, m, x_bytes, out_bytes,
                          mm_bytes):
    """Per-grid-step VMEM footprint estimate (bytes), incl. LN temporaries."""
    m_pad = max(_round_up(m, 8), 8)
    est = 0
    est += 2 * block_n * d * x_bytes            # double-buffered x tile
    est += 3 * block_n * d * 4                  # f32 LN intermediates
    est += block_n * d * mm_bytes               # mm-dtype xn copy
    est += 3 * m_pad * block_n * 4              # sim / p / mask temporaries
    est += 2 * m_pad * max(npad, 128) * out_bytes   # resident attn out block
    est += 2 * m_pad * max(d, 128) * out_bytes      # merged out block
    est += m_pad * max(d, 128) * 4              # acc scratch
    est += (2 + n_tiles) * m_pad * 128 * 4      # m / l / per-tile max scratch
    est += 2 * (m_pad * d * x_bytes + 2 * max(d, 128) * 4)  # q + gamma/beta
    est += 1 << 16                              # misc compiler slack
    return est


def _patch_merger_kernel(x_ref, q_ref, g_ref, b_ref,        # inputs
                         out_ref, attn_ref,                  # outputs
                         acc_ref, m_ref, l_ref, mt_ref,      # scratch
                         *, scale, eps, n_actual, block_n, n_tiles,
                         mm_dtype, approx_recip, mask_tokens, ln_affine_lowp):
    n = pl.program_id(1)                 # token-tile index (reduction axis)
    tn, d = x_ref.shape                  # (block_n, D); batch dim is squeezed

    @pl.when(n == 0)
    def _init():
        m_ref[...] = jnp.full(m_ref.shape, -jnp.inf, dtype=m_ref.dtype)
        l_ref[...] = jnp.zeros(l_ref.shape, dtype=l_ref.dtype)
        acc_ref[...] = jnp.zeros(acc_ref.shape, dtype=acc_ref.dtype)

    # ---- LayerNorm over D: single-pass f32 statistics (var = E[x^2]-mean^2).
    xf = x_ref[...].astype(jnp.float32)                          # (TN, D)
    inv_d = 1.0 / d
    mean = jnp.sum(xf, axis=-1, keepdims=True) * inv_d
    ex2 = jnp.sum(xf * xf, axis=-1, keepdims=True) * inv_d
    var = jnp.maximum(ex2 - mean * mean, 0.0)
    rstd = lax.rsqrt(var + eps)
    if ln_affine_lowp:
        # bf16 VALU path (v6e/v7x): cast once, do gamma/beta in mm_dtype.
        xn_mm = (((xf - mean) * rstd).astype(mm_dtype)
                 * g_ref[...].astype(mm_dtype) + b_ref[...].astype(mm_dtype))
    else:
        xn = ((xf - mean) * rstd * g_ref[...].astype(jnp.float32)
              + b_ref[...].astype(jnp.float32))
        xn_mm = xn.astype(mm_dtype)

    if mask_tokens:
        # The last tile's DMA only fills the in-range rows; zero the rest so
        # 0 * garbage can't inject NaN/Inf into the p @ xn accumulation.
        row = lax.broadcasted_iota(jnp.int32, (tn, 1), 0) + n * block_n
        xn_mm = jnp.where(row < n_actual, xn_mm, jnp.zeros_like(xn_mm))

    # ---- sim tile = queries @ xn^T (plain 2-D matmul, trans-B on the MXU).
    sim = lax.dot_general(q_ref[...].astype(mm_dtype), xn_mm,
                          dimension_numbers=(((1,), (1,)), ((), ())),
                          preferred_element_type=jnp.float32)    # (M, TN)
    if scale != 1.0:
        sim = sim * scale
    if mask_tokens:
        col = lax.broadcasted_iota(jnp.int32, sim.shape, 1) + n * block_n
        sim = jnp.where(col < n_actual, sim, -jnp.inf)

    # ---- online-softmax accumulation of out = attn @ xn.
    m_prev = m_ref[...]
    m_new = jnp.maximum(m_prev, jnp.max(sim, axis=-1, keepdims=True))
    alpha = jnp.exp(m_prev - m_new)
    p = jnp.exp(sim - m_new)                                     # (M, TN) f32
    l_ref[...] = alpha * l_ref[...] + jnp.sum(p, axis=-1, keepdims=True)
    acc_ref[...] = alpha * acc_ref[...] + lax.dot_general(
        p.astype(mm_dtype), xn_mm,
        dimension_numbers=(((1,), (0,)), ((), ())),
        preferred_element_type=jnp.float32)                      # (M, D)
    m_ref[...] = m_new

    # Stash this tile's unnormalized probabilities straight into the resident,
    # lane-dense attn output block (static 128-aligned slabs gated by pl.when)
    # and record the running max used for it. No logit scratch, no second exp.
    for t in range(n_tiles):
        @pl.when(n == t)
        def _store(t=t):
            mt_ref[t] = m_new
            attn_ref[:, t * block_n:(t + 1) * block_n] = p.astype(
                attn_ref.dtype)

    # ---- finalize on the last tile: one rescale pass + merged output store.
    @pl.when(n == n_tiles - 1)
    def _finalize():
        inv_l = pl.reciprocal(l_ref[...], approx=approx_recip)   # (M, 1)
        out_ref[...] = (acc_ref[...] * inv_l).astype(out_ref.dtype)
        m_fin = m_ref[...]
        for t in range(n_tiles):
            corr = jnp.exp(mt_ref[t] - m_fin) * inv_l            # (M, 1)
            slab = attn_ref[:, t * block_n:(t + 1) * block_n]
            attn_ref[:, t * block_n:(t + 1) * block_n] = (
                slab.astype(jnp.float32) * corr).astype(attn_ref.dtype)


def patch_merger(x, queries, gamma, beta, *, scaled_attention=False, eps=1e-5,
                 mm_dtype=jnp.bfloat16, block_n=None, ln_affine_lowp=None):
    """x: (B, N, D); queries: (M, D); gamma/beta: (D,). Returns (out, attn)."""
    B, N, D = x.shape
    M, Dq = queries.shape
    assert D == Dq, "queries embed dim must match x"
    scale = float(D) ** -0.5 if scaled_attention else 1.0
    mm_dtype = jnp.dtype(mm_dtype)
    approx_recip = mm_dtype != jnp.dtype(jnp.float32)
    if ln_affine_lowp is None:
        ln_affine_lowp = mm_dtype != jnp.dtype(jnp.float32)

    x_bytes = x.dtype.itemsize
    out_bytes = x.dtype.itemsize
    mm_bytes = mm_dtype.itemsize

    # ---- generation-aware VMEM budget / tile target.
    try:
        vmem_cap = int(getattr(pltpu.get_tpu_info(), "vmem_capacity_bytes",
                               64 * 2**20))
    except Exception:  # pragma: no cover - conservative fallback
        vmem_cap = 64 * 2**20
    if vmem_cap >= 100 * 2**20:        # 128 MiB parts (v5e / v6e)
        budget, limit_cap, target_n = 64 * 2**20, 100 * 2**20, 1024
    else:                              # 64 MiB parts (v7x)
        budget, limit_cap, target_n = 28 * 2**20, 48 * 2**20, 512

    if block_n is None:
        bn = min(_round_up(N, 128), target_n)
        while bn > 128:
            nt = pl.cdiv(N, bn)
            if _honest_vmem_estimate(bn, nt * bn, nt, D, M, x_bytes, out_bytes,
                                     mm_bytes) <= budget:
                break
            bn -= 128
        block_n = bn
    assert block_n % 128 == 0
    n_tiles = pl.cdiv(N, block_n)
    npad = n_tiles * block_n           # lane-dense attn output width
    mask_tokens = npad != N            # last x tile is partially filled

    est = _honest_vmem_estimate(block_n, npad, n_tiles, D, M, x_bytes,
                                out_bytes, mm_bytes)
    vmem_limit = int(min(limit_cap, max(32 * 2**20, 2 * est)))

    kernel = functools.partial(
        _patch_merger_kernel, scale=scale, eps=eps, n_actual=N,
        block_n=block_n, n_tiles=n_tiles, mm_dtype=mm_dtype,
        approx_recip=approx_recip, mask_tokens=mask_tokens,
        ln_affine_lowp=ln_affine_lowp)

    out, attn_p = pl.pallas_call(
        kernel,
        out_shape=(
            jax.ShapeDtypeStruct((B, M, D), x.dtype),
            jax.ShapeDtypeStruct((B, M, npad), x.dtype),
        ),
        grid_spec=pltpu.PrefetchScalarGridSpec(
            num_scalar_prefetch=0,
            grid=(B, n_tiles),
            in_specs=[
                # x streamed in (block_n, D) tiles; batch dim squeezed out.
                pl.BlockSpec((None, block_n, D), lambda b, n: (b, n, 0)),
                pl.BlockSpec((M, D), lambda b, n: (0, 0)),
                pl.BlockSpec((1, D), lambda b, n: (0, 0)),
                pl.BlockSpec((1, D), lambda b, n: (0, 0)),
            ],
            out_specs=[
                pl.BlockSpec((None, M, D), lambda b, n: (b, 0, 0)),
                pl.BlockSpec((None, M, npad), lambda b, n: (b, 0, 0)),
            ],
            scratch_shapes=[
                pltpu.VMEM((M, D), jnp.float32),            # out accumulator
                pltpu.VMEM((M, 1), jnp.float32),            # running max
                pltpu.VMEM((M, 1), jnp.float32),            # running sum
                pltpu.VMEM((n_tiles, M, 1), jnp.float32),   # per-tile max
            ],
        ),
        compiler_params=pltpu.CompilerParams(
            dimension_semantics=("parallel", "arbitrary"),
            vmem_limit_bytes=vmem_limit),
    )(x, queries, gamma.reshape(1, D), beta.reshape(1, D))

    # Padded columns are exact zeros; slice only when padding exists.
    attn = attn_p if npad == N else attn_p[:, :, :N]
    return out, attn


def _reference(x, queries, gamma, beta, *, scaled_attention=False, eps=1e-5,
               mm_dtype=jnp.float32):
    """Pure-JAX reference. mm_dtype mimics the kernel's MXU operand dtype."""
    scale = float(x.shape[-1]) ** -0.5 if scaled_attention else 1.0
    xf = x.astype(jnp.float32)
    mean = jnp.mean(xf, axis=-1, keepdims=True)
    var = jnp.mean((xf - mean) ** 2, axis=-1, keepdims=True)
    xn = (xf - mean) * lax.rsqrt(var + eps)
    xn = xn * gamma.astype(jnp.float32) + beta.astype(jnp.float32)
    xn_mm = xn.astype(mm_dtype)
    q_mm = queries.astype(mm_dtype)
    sim = jnp.einsum("md,bnd->bmn", q_mm, xn_mm,
                     preferred_element_type=jnp.float32,
                     precision=lax.Precision.HIGHEST) * scale
    attn = jax.nn.softmax(sim, axis=-1)
    out = jnp.einsum("bmn,bnd->bmd", attn.astype(mm_dtype), xn_mm,
                     preferred_element_type=jnp.float32,
                     precision=lax.Precision.HIGHEST)
    return out.astype(x.dtype), attn.astype(x.dtype)


if __name__ == "__main__":
    key = jax.random.PRNGKey(0)
    k1, k2, k3, k4, k5 = jax.random.split(key, 5)

    # Primary small config: batch=2, tokens=8, embed_dim=32, cluster_centers=4.
    B, N, D, M = 2, 8, 32, 4
    x = jax.random.normal(k1, (B, N, D), dtype=jnp.float32)
    queries = jax.random.normal(k2, (M, D), dtype=jnp.float32)  # ~ torch.randn
    gamma = jnp.ones((D,), jnp.float32)                         # LayerNorm default
    beta = jnp.zeros((D,), jnp.float32)

    # (a) f32 MXU path — strict check against the exact reference.
    out, attn = patch_merger(x, queries, gamma, beta, mm_dtype=jnp.float32)
    jax.block_until_ready((out, attn))
    ro, ra = _reference(x, queries, gamma, beta, mm_dtype=jnp.float32)
    assert out.shape == (B, M, D) and attn.shape == (B, M, N)
    assert jnp.allclose(out, ro, atol=1e-4, rtol=1e-4)
    assert jnp.allclose(attn, ra, atol=1e-4, rtol=1e-4)

    # (b) default fast path (bf16 MXU operands + bf16 LN affine, f32 stats,
    #     approx reciprocal). attn rows sum to 1 only to ~1e-3 on this path.
    out_b, attn_b = patch_merger(x, queries, gamma, beta)
    jax.block_until_ready((out_b, attn_b))
    ro_b, ra_b = _reference(x, queries, gamma, beta, mm_dtype=jnp.bfloat16)
    assert jnp.allclose(out_b, ro_b, atol=2e-2, rtol=2e-2)
    assert jnp.allclose(attn_b, ra_b, atol=2e-2, rtol=2e-2)

    # (c) multi-tile / non-128-multiple N / scaled-attention path (no x pad:
    #     the last tile is partial and masked in-kernel).
    B2, N2, Dd, M2 = 2, 300, 32, 5
    x2 = jax.random.normal(k3, (B2, N2, Dd), dtype=jnp.float32)
    q2 = jax.random.normal(k4, (M2, Dd), dtype=jnp.float32)
    g2 = 1.0 + 0.1 * jax.random.normal(k5, (Dd,), dtype=jnp.float32)
    b2 = 0.1 * jax.random.normal(k2, (Dd,), dtype=jnp.float32)
    out2, attn2 = patch_merger(x2, q2, g2, b2, scaled_attention=True,
                               mm_dtype=jnp.float32, block_n=128)
    jax.block_until_ready((out2, attn2))
    ro2, ra2 = _reference(x2, q2, g2, b2, scaled_attention=True,
                          mm_dtype=jnp.float32)
    assert out2.shape == (B2, M2, Dd) and attn2.shape == (B2, M2, N2)
    assert jnp.allclose(out2, ro2, atol=1e-4, rtol=1e-4)
    assert jnp.allclose(attn2, ra2, atol=1e-4, rtol=1e-4)

    print("KERNEL_OK")
</pallas_src>

<mosaic_0001>
module attributes {stable_mosaic.version = 11 : i64} {
  func.func @_patch_merger_kernel(%arg0: i32, %arg1: i32, %arg2: memref<1x128x32xf32, #tpu.memory_space<vmem>>, %arg3: memref<4x32xf32, #tpu.memory_space<vmem>>, %arg4: memref<1x32xf32, #tpu.memory_space<vmem>>, %arg5: memref<1x32xf32, #tpu.memory_space<vmem>>, %arg6: memref<1x4x32xf32, #tpu.memory_space<vmem>>, %arg7: memref<1x4x128xf32, #tpu.memory_space<vmem>>, %arg8: memref<4x32xf32, #tpu.memory_space<vmem>>, %arg9: memref<4x1xf32, #tpu.memory_space<vmem>>, %arg10: memref<4x1xf32, #tpu.memory_space<vmem>>, %arg11: memref<1x4x1xf32, #tpu.memory_space<vmem>>) attributes {dimension_semantics = [#tpu.dimension_semantics<parallel>, #tpu.dimension_semantics<arbitrary>], iteration_bounds = array<i64: 2, 1>, scalar_prefetch = 0 : i64, scratch_operands = 4 : i64, tpu.core_type = #tpu.core_type<tc>, window_params = [{transform_indices = @transform_0, window_bounds = array<i64: 1, 128, 32>}, {pipeline_mode = #tpu.pipeline_mode<synchronous>, transform_indices = @transform_1, window_bounds = array<i64: 4, 32>}, {pipeline_mode = #tpu.pipeline_mode<synchronous>, transform_indices = @transform_2, window_bounds = array<i64: 1, 32>}, {pipeline_mode = #tpu.pipeline_mode<synchronous>, transform_indices = @transform_3, window_bounds = array<i64: 1, 32>}, {transform_indices = @transform_4, window_bounds = array<i64: 1, 4, 32>}, {transform_indices = @transform_5, window_bounds = array<i64: 1, 4, 128>}]} {
    %c0_i32 = arith.constant 0 : i32
    %0 = arith.cmpi eq, %arg1, %c0_i32 : i32
    %1 = arith.extui %0 : i1 to i32
    %c0_i32_0 = arith.constant 0 : i32
    %2 = arith.cmpi ne, %1, %c0_i32_0 : i32
    scf.if %2 {
      %cst_38 = arith.constant 0xFF800000 : f32
      %79 = vector.broadcast %cst_38 : f32 to vector<4x1xf32>
      %c0_39 = arith.constant 0 : index
      %c0_40 = arith.constant 0 : index
      %80 = vector.load %arg9[%c0_39, %c0_40] : memref<4x1xf32, #tpu.memory_space<vmem>>, vector<4x1xf32>
      tpu.vector_store %arg9[%c0_39, %c0_40], %79 {strides = array<i32>} : memref<4x1xf32, #tpu.memory_space<vmem>>, vector<4x1xf32>,
      %cst_41 = arith.constant 0.000000e+00 : f32
      %81 = vector.broadcast %cst_41 : f32 to vector<4x1xf32>
      %c0_42 = arith.constant 0 : index
      %c0_43 = arith.constant 0 : index
      %82 = vector.load %arg10[%c0_42, %c0_43] : memref<4x1xf32, #tpu.memory_space<vmem>>, vector<4x1xf32>
      tpu.vector_store %arg10[%c0_42, %c0_43], %81 {strides = array<i32>} : memref<4x1xf32, #tpu.memory_space<vmem>>, vector<4x1xf32>,
      %cst_44 = arith.constant 0.000000e+00 : f32
      %83 = vector.broadcast %cst_44 : f32 to vector<4x32xf32>
      %c0_45 = arith.constant 0 : index
      %c0_46 = arith.constant 0 : index
      %84 = vector.load %arg8[%c0_45, %c0_46] : memref<4x32xf32, #tpu.memory_space<vmem>>, vector<4x32xf32>
      tpu.vector_store %arg8[%c0_45, %c0_46], %83 {strides = array<i32>} : memref<4x32xf32, #tpu.memory_space<vmem>>, vector<4x32xf32>,
    } else {
    }
    %c0 = arith.constant 0 : index
    %c0_1 = arith.constant 0 : index
    %c0_2 = arith.constant 0 : index
    %3 = vector.load %arg2[%c0, %c0_1, %c0_2] : memref<1x128x32xf32, #tpu.memory_space<vmem>>, vector<1x128x32xf32>
    %4 = vector.shape_cast %3 : vector<1x128x32xf32> to vector<128x32xf32>
    %cst = arith.constant dense<0.000000e+00> : vector<128xf32>
    %5 = vector.multi_reduction <add>, %4, %cst [1] : vector<128x32xf32> to vector<128xf32>
    %6 = vector.shape_cast %5 : vector<128xf32> to vector<128x1xf32>
    %cst_3 = arith.constant 3.125000e-02 : f32
    %7 = vector.broadcast %cst_3 : f32 to vector<128x1xf32>
    %8 = arith.mulf %6, %7 : vector<128x1xf32>
    %9 = arith.mulf %4, %4 : vector<128x32xf32>
    %cst_4 = arith.constant dense<0.000000e+00> : vector<128xf32>
    %10 = vector.multi_reduction <add>, %9, %cst_4 [1] : vector<128x32xf32> to vector<128xf32>
    %11 = vector.shape_cast %10 : vector<128xf32> to vector<128x1xf32>
    %cst_5 = arith.constant 3.125000e-02 : f32
    %12 = vector.broadcast %cst_5 : f32 to vector<128x1xf32>
    %13 = arith.mulf %11, %12 : vector<128x1xf32>
    %14 = arith.mulf %8, %8 : vector<128x1xf32>
    %15 = arith.subf %13, %14 : vector<128x1xf32>
    %cst_6 = arith.constant 0.000000e+00 : f32
    %16 = vector.broadcast %cst_6 : f32 to vector<128x1xf32>
    %17 = arith.maximumf %15, %16 : vector<128x1xf32>
    %cst_7 = arith.constant 9.99999974E-6 : f32
    %18 = vector.broadcast %cst_7 : f32 to vector<128x1xf32>
    %19 = arith.addf %17, %18 : vector<128x1xf32>
    %20 = math.rsqrt %19 : vector<128x1xf32>
    %21 = vector.broadcast %8 : vector<128x1xf32> to vector<128x32xf32>
    %22 = arith.subf %4, %21 : vector<128x32xf32>
    %23 = vector.broadcast %20 : vector<128x1xf32> to vector<128x32xf32>
    %24 = arith.mulf %22, %23 : vector<128x32xf32>
    %c0_8 = arith.constant 0 : index
    %c0_9 = arith.constant 0 : index
    %25 = vector.load %arg4[%c0_8, %c0_9] : memref<1x32xf32, #tpu.memory_space<vmem>>, vector<1x32xf32>
    %26 = vector.broadcast %25 : vector<1x32xf32> to vector<128x32xf32>
    %27 = arith.mulf %24, %26 : vector<128x32xf32>
    %c0_10 = arith.constant 0 : index
    %c0_11 = arith.constant 0 : index
    %28 = vector.load %arg5[%c0_10, %c0_11] : memref<1x32xf32, #tpu.memory_space<vmem>>, vector<1x32xf32>
    %29 = vector.broadcast %28 : vector<1x32xf32> to vector<128x32xf32>
    %30 = arith.addf %27, %29 : vector<128x32xf32>
    %31 = tpu.iota {dimensions = array<i32: 0>} : vector<128x1xi32>
    %c128_i32 = arith.constant 128 : i32
    %32 = arith.muli %arg1, %c128_i32 : i32
    %33 = vector.broadcast %32 : i32 to vector<128x1xi32>
    %34 = arith.addi %31, %33 : vector<128x1xi32>
    %c8_i32 = arith.constant 8 : i32
    %35 = vector.broadcast %c8_i32 : i32 to vector<128x1xi32>
    %36 = arith.cmpi slt, %34, %35 : vector<128x1xi32>
    %cst_12 = arith.constant 0.000000e+00 : f32
    %37 = vector.broadcast %cst_12 : f32 to vector<128x32xf32>
    %38 = vector.shape_cast %36 : vector<128x1xi1> to vector<128x1xi1>
    %39 = vector.broadcast %38 : vector<128x1xi1> to vector<128x32xi1>
    %40 = arith.select %39, %30, %37 : vector<128x32xi1>, vector<128x32xf32>
    %c0_13 = arith.constant 0 : index
    %c0_14 = arith.constant 0 : index
    %41 = vector.load %arg3[%c0_13, %c0_14] : memref<4x32xf32, #tpu.memory_space<vmem>>, vector<4x32xf32>
    %cst_15 = arith.constant dense<0.000000e+00> : vector<4x128xf32>
    %42 = tpu.matmul %41, %40, %cst_15 {dimension_numbers = #tpu.dot_dimension_numbers<[1], [1], [0], [0], [0, 0, 1, 0], [], []>} : vector<4x32xf32>, vector<128x32xf32>, vector<4x128xf32> -> vector<4x128xf32>
    %43 = tpu.iota {dimensions = array<i32: 1>} : vector<4x128xi32>
    %c128_i32_16 = arith.constant 128 : i32
    %44 = arith.muli %arg1, %c128_i32_16 : i32
    %45 = vector.broadcast %44 : i32 to vector<4x128xi32>
    %46 = arith.addi %43, %45 : vector<4x128xi32>
    %c8_i32_17 = arith.constant 8 : i32
    %47 = vector.broadcast %c8_i32_17 : i32 to vector<4x128xi32>
    %48 = arith.cmpi slt, %46, %47 : vector<4x128xi32>
    %cst_18 = arith.constant 0xFF800000 : f32
    %49 = vector.broadcast %cst_18 : f32 to vector<4x128xf32>
    %50 = arith.select %48, %42, %49 : vector<4x128xi1>, vector<4x128xf32>
    %c0_19 = arith.constant 0 : index
    %c0_20 = arith.constant 0 : index
    %51 = vector.load %arg9[%c0_19, %c0_20] : memref<4x1xf32, #tpu.memory_space<vmem>>, vector<4x1xf32>
    %cst_21 = arith.constant dense<0xFF800000> : vector<4xf32>
    %52 = vector.multi_reduction <maximumf>, %50, %cst_21 [1] : vector<4x128xf32> to vector<4xf32>
    %53 = vector.shape_cast %52 : vector<4xf32> to vector<4x1xf32>
    %54 = arith.maximumf %51, %53 : vector<4x1xf32>
    %55 = arith.subf %51, %54 : vector<4x1xf32>
    %56 = math.exp %55 : vector<4x1xf32>
    %57 = vector.broadcast %54 : vector<4x1xf32> to vector<4x128xf32>
    %58 = arith.subf %50, %57 : vector<4x128xf32>
    %59 = math.exp %58 : vector<4x128xf32>
    %c0_22 = arith.constant 0 : index
    %c0_23 = arith.constant 0 : index
    %60 = vector.load %arg10[%c0_22, %c0_23] : memref<4x1xf32, #tpu.memory_space<vmem>>, vector<4x1xf32>
    %61 = arith.mulf %56, %60 : vector<4x1xf32>
    %cst_24 = arith.constant dense<0.000000e+00> : vector<4xf32>
    %62 = vector.multi_reduction <add>, %59, %cst_24 [1] : vector<4x128xf32> to vector<4xf32>
    %63 = vector.shape_cast %62 : vector<4xf32> to vector<4x1xf32>
    %64 = arith.addf %61, %63 : vector<4x1xf32>
    %c0_25 = arith.constant 0 : index
    %c0_26 = arith.constant 0 : index
    %65 = vector.load %arg10[%c0_25, %c0_26] : memref<4x1xf32, #tpu.memory_space<vmem>>, vector<4x1xf32>
    tpu.vector_store %arg10[%c0_25, %c0_26], %64 {strides = array<i32>} : memref<4x1xf32, #tpu.memory_space<vmem>>, vector<4x1xf32>,
    %c0_27 = arith.constant 0 : index
    %c0_28 = arith.constant 0 : index
    %66 = vector.load %arg8[%c0_27, %c0_28] : memref<4x32xf32, #tpu.memory_space<vmem>>, vector<4x32xf32>
    %67 = vector.broadcast %56 : vector<4x1xf32> to vector<4x32xf32>
    %68 = arith.mulf %67, %66 : vector<4x32xf32>
    %cst_29 = arith.constant dense<0.000000e+00> : vector<4x32xf32>
    %69 = tpu.matmul %59, %40, %cst_29 {dimension_numbers = #tpu.dot_dimension_numbers<[1], [0], [0], [1], [0, 0, 1, 1], [], []>} : vector<4x128xf32>, vector<128x32xf32>, vector<4x32xf32> -> vector<4x32xf32>
    %70 = arith.addf %68, %69 : vector<4x32xf32>
    %c0_30 = arith.constant 0 : index
    %c0_31 = arith.constant 0 : index
    %71 = vector.load %arg8[%c0_30, %c0_31] : memref<4x32xf32, #tpu.memory_space<vmem>>, vector<4x32xf32>
    tpu.vector_store %arg8[%c0_30, %c0_31], %70 {strides = array<i32>} : memref<4x32xf32, #tpu.memory_space<vmem>>, vector<4x32xf32>,
    %c0_32 = arith.constant 0 : index
    %c0_33 = arith.constant 0 : index
    %72 = vector.load %arg9[%c0_32, %c0_33] : memref<4x1xf32, #tpu.memory_space<vmem>>, vector<4x1xf32>
    tpu.vector_store %arg9[%c0_32, %c0_33], %54 {strides = array<i32>} : memref<4x1xf32, #tpu.memory_space<vmem>>, vector<4x1xf32>,
    %c0_i32_34 = arith.constant 0 : i32
    %73 = arith.cmpi eq, %arg1, %c0_i32_34 : i32
    %74 = arith.extui %73 : i1 to i32
    %c0_i32_35 = arith.constant 0 : i32
    %75 = arith.cmpi ne, %74, %c0_i32_35 : i32
    scf.if %75 {
      %c0_38 = arith.constant 0 : index
      %c0_39 = arith.constant 0 : index
      %c0_40 = arith.constant 0 : index
      %79 = vector.load %arg11[%c0_38, %c0_39, %c0_40] : memref<1x4x1xf32, #tpu.memory_space<vmem>>, vector<1x4x1xf32>
      %80 = vector.shape_cast %79 : vector<1x4x1xf32> to vector<4x1xf32>
      %81 = vector.shape_cast %54 : vector<4x1xf32> to vector<1x4x1xf32>
      tpu.vector_store %arg11[%c0_38, %c0_39, %c0_40], %81 {strides = array<i32>} : memref<1x4x1xf32, #tpu.memory_space<vmem>>, vector<1x4x1xf32>,
      %c0_41 = arith.constant 0 : index
      %c0_42 = arith.constant 0 : index
      %c0_43 = arith.constant 0 : index
      %82 = vector.load %arg7[%c0_41, %c0_42, %c0_43] : memref<1x4x128xf32, #tpu.memory_space<vmem>>, vector<1x4x128xf32>
      %83 = vector.shape_cast %82 : vector<1x4x128xf32> to vector<4x128xf32>
      %84 = vector.shape_cast %59 : vector<4x128xf32> to vector<1x4x128xf32>
      tpu.vector_store %arg7[%c0_41, %c0_42, %c0_43], %84 {strides = array<i32>} : memref<1x4x128xf32, #tpu.memory_space<vmem>>, vector<1x4x128xf32>,
    } else {
    }
    %c0_i32_36 = arith.constant 0 : i32
    %76 = arith.cmpi eq, %arg1, %c0_i32_36 : i32
    %77 = arith.extui %76 : i1 to i32
    %c0_i32_37 = arith.constant 0 : i32
    %78 = arith.cmpi ne, %77, %c0_i32_37 : i32
    scf.if %78 {
      %c0_38 = arith.constant 0 : index
      %c0_39 = arith.constant 0 : index
      %79 = vector.load %arg10[%c0_38, %c0_39] : memref<4x1xf32, #tpu.memory_space<vmem>>, vector<4x1xf32>
      %80 = tpu.reciprocal %79 : vector<4x1xf32> -> vector<4x1xf32>
      %c0_40 = arith.constant 0 : index
      %c0_41 = arith.constant 0 : index
      %81 = vector.load %arg8[%c0_40, %c0_41] : memref<4x32xf32, #tpu.memory_space<vmem>>, vector<4x32xf32>
      %82 = vector.broadcast %80 : vector<4x1xf32> to vector<4x32xf32>
      %83 = arith.mulf %81, %82 : vector<4x32xf32>
      %c0_42 = arith.constant 0 : index
      %c0_43 = arith.constant 0 : index
      %c0_44 = arith.constant 0 : index
      %84 = vector.load %arg6[%c0_42, %c0_43, %c0_44] : memref<1x4x32xf32, #tpu.memory_space<vmem>>, vector<1x4x32xf32>
      %85 = vector.shape_cast %84 : vector<1x4x32xf32> to vector<4x32xf32>
      %86 = vector.shape_cast %83 : vector<4x32xf32> to vector<1x4x32xf32>
      tpu.vector_store %arg6[%c0_42, %c0_43, %c0_44], %86 {strides = array<i32>} : memref<1x4x32xf32, #tpu.memory_space<vmem>>, vector<1x4x32xf32>,
      %c0_45 = arith.constant 0 : index
      %c0_46 = arith.constant 0 : index
      %87 = vector.load %arg9[%c0_45, %c0_46] : memref<4x1xf32, #tpu.memory_space<vmem>>, vector<4x1xf32>
      %c0_47 = arith.constant 0 : index
      %c0_48 = arith.constant 0 : index
      %c0_49 = arith.constant 0 : index
      %88 = vector.load %arg11[%c0_47, %c0_48, %c0_49] : memref<1x4x1xf32, #tpu.memory_space<vmem>>, vector<1x4x1xf32>
      %89 = vector.shape_cast %88 : vector<1x4x1xf32> to vector<4x1xf32>
      %90 = arith.subf %89, %87 : vector<4x1xf32>
      %91 = math.exp %90 : vector<4x1xf32>
      %92 = arith.mulf %91, %80 : vector<4x1xf32>
      %c0_50 = arith.constant 0 : index
      %c0_51 = arith.constant 0 : index
      %c0_52 = arith.constant 0 : index
      %93 = vector.load %arg7[%c0_50, %c0_51, %c0_52] : memref<1x4x128xf32, #tpu.memory_space<vmem>>, vector<1x4x128xf32>
      %94 = vector.shape_cast %93 : vector<1x4x128xf32> to vector<4x128xf32>
      %95 = vector.broadcast %92 : vector<4x1xf32> to vector<4x128xf32>
      %96 = arith.mulf %94, %95 : vector<4x128xf32>
      %c0_53 = arith.constant 0 : index
      %c0_54 = arith.constant 0 : index
      %c0_55 = arith.constant 0 : index
      %97 = vector.load %arg7[%c0_53, %c0_54, %c0_55] : memref<1x4x128xf32, #tpu.memory_space<vmem>>, vector<1x4x128xf32>
      %98 = vector.shape_cast %97 : vector<1x4x128xf32> to vector<4x128xf32>
      %99 = vector.shape_cast %96 : vector<4x128xf32> to vector<1x4x128xf32>
      tpu.vector_store %arg7[%c0_53, %c0_54, %c0_55], %99 {strides = array<i32>} : memref<1x4x128xf32, #tpu.memory_space<vmem>>, vector<1x4x128xf32>,
    } else {
    }
    return
  }
  func.func @transform_0(%arg0: i32, %arg1: i32) -> (i32, i32, i32) {
    %c0_i32 = arith.constant 0 : i32
    %c0_i32_0 = arith.constant 0 : i32
    return %arg0, %arg1, %c0_i32 : i32, i32, i32
  }
  func.func @transform_1(%arg0: i32, %arg1: i32) -> (i32, i32) {
    %c0_i32 = arith.constant 0 : i32
    %c0_i32_0 = arith.constant 0 : i32
    %c0_i32_1 = arith.constant 0 : i32
    return %c0_i32, %c0_i32_0 : i32, i32
  }
  func.func @transform_2(%arg0: i32, %arg1: i32) -> (i32, i32) {
    %c0_i32 = arith.constant 0 : i32
    %c0_i32_0 = arith.constant 0 : i32
    %c0_i32_1 = arith.constant 0 : i32
    return %c0_i32, %c0_i32_0 : i32, i32
  }
  func.func @transform_3(%arg0: i32, %arg1: i32) -> (i32, i32) {
    %c0_i32 = arith.constant 0 : i32
    %c0_i32_0 = arith.constant 0 : i32
    %c0_i32_1 = arith.constant 0 : i32
    return %c0_i32, %c0_i32_0 : i32, i32
  }
  func.func @transform_4(%arg0: i32, %arg1: i32) -> (i32, i32, i32) {
    %c0_i32 = arith.constant 0 : i32
    %c0_i32_0 = arith.constant 0 : i32
    %c0_i32_1 = arith.constant 0 : i32
    return %arg0, %c0_i32, %c0_i32_0 : i32, i32, i32
  }
  func.func @transform_5(%arg0: i32, %arg1: i32) -> (i32, i32, i32) {
    %c0_i32 = arith.constant 0 : i32
    %c0_i32_0 = arith.constant 0 : i32
    %c0_i32_1 = arith.constant 0 : i32
    return %arg0, %c0_i32, %c0_i32_0 : i32, i32, i32
  }
}

</mosaic_0001>

<bundles_post_ra>
// kernel: tpu_custom_call.1
= control target key start
LH: loop header
LB: loop body
LE: loop exit
PB: predicated region body
PF: predicated region fallthrough
CT: control target
= control target key end

     0   :  { %s1735_s0 = inlined_call_operand.hbm [shape: f32[2,8,32], index: 0, kind: input, shape index: {}]   ;;  %s1736_s1 = inlined_call_operand.hbm [shape: f32[4,32], index: 1, kind: input, shape index: {}]   ;;  %s1737_s2 = inlined_call_operand.vmem [shape: f32[1,32], index: 2, kind: input, shape index: {}]   ;;  %s1738_s3 = inlined_call_operand.vmem [shape: f32[1,32], index: 3, kind: input, shape index: {}]   ;;  %s1739_s4 = inlined_call_operand.hbm [shape: f32[2,4,32], index: 4, kind: output, shape index: {0}]   ;;  %s1740_s5 = inlined_call_operand.hbm [shape: f32[2,4,128], index: 5, kind: output, shape index: {1}]  }
   0x1   :  { %1746 = sst [smem:[#allocation18_spill]] %s1736_s1 }
   0x2   :  { %11 = vsyncpa [#allocation7], 0 }
   0x3   :  { %13 = vsyncpa [#allocation7 + $0x1], 0 }
   0x4   :  { %14 = vsyncpa [#allocation10], 0 }
   0x5   :  { %15 = vsyncpa [#allocation8], 0 }
   0x6   :  { %17 = vsyncpa [#allocation8 + $0x1], 0 }
   0x7   :  { %18 = vsyncpa [#allocation13], 0 }
   0x8   :  { %20 = vsyncpa [#allocation13 + $0x1], 0  ;;  %s1470_s18 = smov 0   ;;  %s1472_s19 = smov 0  }
   0x9   :  { %s1474_s20 = smov 0   ;;  %s1476_s21 = smov 0  }
   0xa   :  { %s1478_s22 = smov 0   ;;  %s1480_s23 = smov 0  }
   0xb LB: > { %s1132_s24 = sadd.s32 4294967295, %s1428_s23   ;;  %s1133_s25 = sadd.s32 4294967294, %s1428_s23   ;;  %s1428_s23 = sphi %s1480_s23, %s26_s23   ;;  %s1424_s22 = sphi %s1478_s22, %s1765_s22   ;;  %s1420_s21 = sphi %s1476_s21, %s1764_s21   ;;  %s1416_s20 = sphi %s1474_s20, %s1763_s20   ;;  %s1412_s19 = sphi %s1472_s19, %s1762_s19   ;;  %s1408_s18 = sphi %s1470_s18, %s1761_s18  }
   0xc   : > { %s38_s26 = sadd.s32 1, %s1424_s22  ;;  %s47_s27 = sadd.s32 1, %s1416_s20 }
   0xd   : > { %p40_p0 = scmp.ge.s32.totalorder %s38_s26, 2  ;;  %p54_p1 = scmp.ne.s32.totalorder %s1416_s20, %s1412_s19 }
   0xe   : > { %p55_p2 = scmp.eq.s32.totalorder %s1428_s23, 0  ;;  %p60_p3 = scmp.ne.s32.totalorder %s1412_s19, %s1408_s18 }
   0xf   : > { %s1767_s26 = smov (%p40_p0, %s38_s26), 0  ;;  %p1515_p5 = scmp.eq.s32.totalorder %s1132_s24, 0 }
  0x10   : > { %p1511_p4 = por %p55_p2, %p54_p1  ;;  %s42_s30 = ssub.s32 %s1424_s22, %s1767_s26 }
  0x11   : > { %s1748_s29 = scalar_select %p1515_p5, 1, 0 }
  0x12   : > { %s1747_s28 = scalar_select %p1511_p4, 1, 0 }
  0x13   : > { %p147_p6 = scmp.eq.s32.totalorder %s1132_s24, 1  ;;  %p45_p7 = scmp.eq.s32.totalorder %s42_s30, 0 }
  0x14   : > { %p1523_p8 = por %p1515_p5, %p60_p3  ;;  %p153_p10 = scmp.eq.s32.totalorder %s1133_s25, 1 }
  0x15   : > { %p1527_p9 = por %p147_p6, %p54_p1  ;;  %p1134_p12 = scmp.ge.s32.totalorder %s1428_s23, 1 }
  0x16   : > { %s1749_s6 = scalar_select %p1523_p8, 1, 0 }
  0x17   : > { %s1750_s7 = scalar_select %p1527_p9, 1, 0 }
  0x18   : > { %s1532_s8 = scalar_select %p45_p7, %s1416_s20, %s47_s27  }
  0x19   : > { %p1534_p11 = por %p153_p10, %p60_p3  ;;  %p186_p13 = scmp.lt.s32.totalorder %s1428_s23, 3 }
  0x1a   : > { %s1430_s11 = smov [#allocation9]   ;;  %s1754_s1 = sld [smem:[#allocation18_spill]] }
  0x1b   : > { %s1751_s9 = scalar_select %p1534_p11, 1, 0 }
  0x1c   : > { %p1540_p0 = pnand %p1134_p12, %p186_p13  ;;  %s199_s12 = sshll.u32 %s1430_s11, 4  ;;  %s200_s12 = int_to_ptr.vmem [resolvable:$true] %s199_s12 }
  0x1e   : > { %s1752_s10 = scalar_select %p1540_p0, 1, 0 }
  0x1f   : > { %p1177_p1 = pneg %p1540_p0 }
  0x20   : > { %s1258_s16 = scalar_lea.hbm %s1754_s1, 64 }
  0x21   : > { %p1548_p2 = pnand %p1177_p1, %p1515_p5  ;;  %p1259_p3 = scmp.ne.s32.totalorder %s1754_s1, %s1258_s16 }
  0x22   : > { %p1265_p12 = scmp.lt.u32.totalorder %s1258_s16, %s1754_s1 }
  0x23   : > { %p1260_p6 = pneg %p1548_p2 }
  0x25   : > { %p1261_p7 = pnand %p1260_p6, %p1259_p3 }
  0x27   : > { %p1262_p10 = pneg %p1261_p7 }
  0x29   : > { %p1267_p13 = pnand %p1265_p12, %p1262_p10 }
  0x2b   : > { %1270 = shalt.err (!%p1267_p13)
}
  0x2c   : > { %s1271_s30 = scalar_lea.vmem %s200_s12, 64  ;;  %p1279_p5 = scmp.lt.s32.totalorder %s200_s12, %s200_s12 }
  0x2d   : > { %p1272_p1 = scmp.ne.s32.totalorder %s200_s12, %s1271_s30  ;;  %p1280_p8 = scmp.lt.s32.totalorder %s1271_s30, %s1271_s30 }
  0x2f   : > { %p1274_p11 = pnand %p1272_p1, %p1260_p6  ;;  %p1281_p0 = por %p1280_p8, %p1279_p5 }
  0x31   : > { %p1275_p9 = pneg %p1274_p11 }
  0x33   : > { %p1282_p4 = pnand %p1281_p0, %p1275_p9 }
  0x35   : > { %1285 = shalt.err (!%p1282_p4)
}
  0x36   : > { %1180 = dma.hbm_to_vmem [thread:$0]  (!%p1548_p2), %s1754_s1, 64, %s200_s12, [#allocation10]  }
  0x37   : > { %p1136_p3 = scmp.ge.s32.totalorder %s1428_s23, 2 }
  0x38   : > { %p1755_p7 = scmp.ne.s32.totalorder (!%p1136_p3), %s1747_s28, 0 }
  0x39   : > { %212 = sbr.rel (%p1136_p3) target bundleno = 95 (0x5f), region = 28 }
  0x40   : > { %215 = sbr.rel (!%p1755_p7) target bundleno = 95 (0x5f), region = 32  ;;  %s216_s15 = sand.u32 (%p1755_p7), 1, %s1416_s20  }
  0x41   : > { %s1137_s16 = sshll.u32 (%p1755_p7), %s216_s15, 7  ;;  %s1574_s17 = scalar_lea.sflag (%p1755_p7), [#allocation7], %s216_s15 }
  0x42   : > { %s220_s24 = scalar_lea.vmem (%p1755_p7), [#allocation6], %s1137_s16 }
  0x47   : > { %226 = vsyncadd %s1574_s17, 1920  ;;  %s1138_s13 = sshll.u32 %s1424_s22, 7  ;;  %s232_s25 = sshll.u32 %s220_s24, 4  ;;  %s233_s25 = int_to_ptr.vmem [resolvable:$true] %s232_s25 }
  0x48   : > { %s1581_s30 = scalar_lea.hbm %s1735_s0, %s1138_s13  ;;  %s1288_s15 = scalar_lea.hbm %s1735_s0, 256 }
  0x49   : > { %s1286_s28 = scalar_lea.hbm %s1581_s30, 128  ;;  %p1289_p5 = scmp.lt.u32.totalorder %s1581_s30, %s1735_s0 }
  0x4a   : > { %p1287_p4 = scmp.ne.s32.totalorder %s1581_s30, %s1286_s28  ;;  %p1290_p8 = scmp.lt.u32.totalorder %s1288_s15, %s1286_s28 }
  0x4b   : > { %p1292_p11 = scmp.lt.u32.totalorder %s1286_s28, %s1581_s30 }
  0x4c   : > { %p1291_p9 = por %p1290_p8, %p1289_p5 }
  0x4e   : > { %p1293_p0 = por %p1292_p11, %p1291_p9 }
  0x50   : > { %p1294_p2 = pnand %p1293_p0, %p1287_p4 }
  0x52   : > { %1297 = shalt.err (!%p1294_p2)
}
  0x53   : > { %s1298_s24 = scalar_lea.vmem %s233_s25, 128  ;;  %s1431_s13 = smov [#allocation6]  }
  0x54   : > { %p1299_p6 = scmp.ne.s32.totalorder %s233_s25, %s1298_s24  ;;  %s1300_s12 = sshll.u32 %s1431_s13, 4  ;;  %s1301_s12 = int_to_ptr.vmem [resolvable:$false] %s1300_s12 }
  0x55   : > { %s1302_s27 = scalar_lea.vmem %s1301_s12, 4096  ;;  %p1303_p10 = scmp.lt.s32.totalorder %s233_s25, %s1301_s12 }
  0x56   : > { %p1304_p12 = scmp.lt.s32.totalorder %s1302_s27, %s1298_s24 }
  0x58   : > { %p1305_p13 = por %p1304_p12, %p1303_p10 }
  0x5a   : > { %p1306_p1 = pnand %p1305_p13, %p1299_p6 }
  0x5c   : > { %1309 = shalt.err (!%p1306_p1)
}
  0x5d   : > { %s1432_s11 = smov 128   ;;  %s1433_s1 = smov 8  }
  0x5e   : > { %238 = dma.hbm_to_vmem [thread:$0]  %s1581_s30, 128, %s233_s25, %s1574_s17, %s1432_s11, %s1432_s11, %s1433_s1  }
  0x5f PF: > { %p1756_p7 = scmp.ne.s32.totalorder %s1752_s10, 0 }
  0x60   : > { %s1598_s28 = sand.u32 (!%p1756_p7), 1, %s1412_s19   ;;  %p1757_p4 = scmp.ne.s32.totalorder (!%p1756_p7), %s1749_s6, 0 }
  0x61   : > { %244 = sbr.rel (%p1756_p7) target bundleno = 1117 (0x45d), region = 36  ;;  %s1140_s14 = sshll.u32 (!%p1756_p7), %s1598_s28, 7 }
  0x62   : > { %s247_s15 = scalar_lea.sflag (!%p1756_p7), [#allocation7], %s1598_s28  ;;  %s250_s16 = scalar_lea.vmem (!%p1756_p7), [#allocation6], %s1140_s14 }
  0x68   : > { %1391 = dma.done.wait (%p1757_p4), %s247_s15, 2048  }
  0x69   : > { %1393 = vsyncadd (%p1757_p4), %s247_s15, 4294965248  ;;  %p1758_p5 = scmp.ne.s32.totalorder %s1748_s29, 0 }
  0x6b   : > { %1395 = dma.done.wait (%p1758_p5), [#allocation10], 64  }
  0x6c   : > { %1397 = vsyncadd (%p1758_p5), [#allocation10], 4294967232  ;;  %vm314_vm0 = vcmask 261120   ;;  %v298_v0 = vld [vmem:[%s250_s16] sm:$0xff]  ;;  %v1434_v4 = vmov 0.0   ;;  %vm1435_vm1 = vmmov 0   ;;  %v838_v22 = vlaneseq }
  0x6d   : > { %v315_v1 = vsel %vm314_vm0, %v298_v0, 0.0  ;;  %v379_v2 = vmul.f32 %v298_v0, %v298_v0  ;;  %1158 = vmatprep.subr.mxu0 %v1434_v4  ;;  %1163 = vmatprep.subr.mxu1 %v1434_v4  ;;  %v1144_v15 = vld [vmem:[%s1737_s2] ss:$0 sm:$0xff]  ;;  %v716_v20 = vld [vmem:[#allocation9] sm:$0xf]  ;;  %vm293_vm2 = vcmask 3072  }
  0x6e   : > { %316 = vadd.xlane.f32.xlu0 %v315_v1  ;;  %1160 = vmatprep.mubr.msk.f32.mxu0 %vm1435_vm1, %v1434_v4  ;;  %v1145_v17 = vld [vmem:[%s1738_s3] ss:$0 sm:$0xff]  ;;  %v1436_v21 = vmov -inf   ;;  %295 = vst.msk [vmem:[#allocation4] sm:$0xf] %vm293_vm2, %v1434_v4  ;;  %v839_v23 = vand.u32 127, %v838_v22 }
  0x6f   : > { %v395_v3 = vsel %vm314_vm0, %v379_v2, 0.0  ;;  %1165 = vmatprep.mubr.msk.f32.mxu1 %vm1435_vm1, %v1434_v4  ;;  %294 = vst.msk [vmem:[#allocation3] sm:$0xf] %vm293_vm2, %v1436_v21  ;;  %vm844_vm4 = vcmask 1043456   ;;  %v1437_v28 = vmov 0   ;;  %s1142_s25 = sshll.u32 %s1598_s28, 2 }
  0x70   : > { %vm841_vm3 = vcmp.lt.s32.totalorder %v839_v23, 8  ;;  %1246 = vset.pattern.permute.xlu1 %v1437_v28  ;;  %1247 = vset.pattern.permute.xlu0 %v1437_v28  ;;  %s1634_s30 = scalar_lea.vmem [#allocation12], %s1142_s25  ;;  %vm296_vm5 = vcmask 257024   ;;  %s1150_s24 = sshll.u32 %s1420_s21, 6 }
  0x71   : > { %297 = vst.msk [vmem:[#allocation2] sm:$0xf] %vm296_vm5, %v1434_v4  ;;  %s278_s13 = scalar_lea.vmem [#allocation11], %s1142_s25  ;;  %s1649_s1 = scalar_lea.hbm %s1739_s4, %s1150_s24 }
  0x72   : > { %396 = vadd.xlane.f32.xlu0 %v395_v3  ;;  %s997_s12 = sshll.u32 %s278_s13, 4  ;;  %s1010_s14 = sshll.u32 %s1634_s30, 4  ;;  %s1651_s12 = int_to_ptr.vmem [resolvable:$true] %s997_s12  ;;  %s1687_s14 = int_to_ptr.vmem [resolvable:$true] %s1010_s14 }
  0x73   : > { %s979_s15 = scalar_lea.sflag [#allocation8], %s1598_s28  ;;  %s1310_s16 = scalar_lea.vmem %s1651_s12, 64 }
  0x74   : > { %p1311_p8 = scmp.ne.s32.totalorder %s1651_s12, %s1310_s16  ;;  %p1759_p9 = scmp.ne.s32.totalorder %s1750_s7, 0 }
  0x75   : > { %v860_v40 = vld [vmem:[#allocation4] sm:$0xf]  ;;  %s1438_s29 = smov [#allocation11]  }
  0x76   : > { %v843_v29 = vld [vmem:[#allocation3] sm:$0xf]  ;;  %p1312_p11 = pnand %p1311_p8, %p1759_p9  ;;  %s1314_s6 = sshll.u32 %s1438_s29, 4  ;;  %s1315_s6 = int_to_ptr.vmem [resolvable:$false] %s1314_s6 }
  0x77   : > { %s1316_s10 = scalar_lea.vmem %s1315_s6, 128  ;;  %p1317_p2 = scmp.lt.s32.totalorder %s1651_s12, %s1315_s6 }
  0x78   : > { %v868_v52 = vld [vmem:[#allocation2] sm:$0xf]  ;;  %p1313_p0 = pneg %p1312_p11  ;;  %p1318_p6 = scmp.lt.s32.totalorder %s1316_s10, %s1310_s16 }
  0x7a   : > { %p1319_p10 = por %p1318_p6, %p1317_p2 }
  0x7c   : > { %p1320_p12 = pnand %p1319_p10, %p1313_p0 }
  0xfb   : > { %v317_v5 = vpop.xlane.xlu0 %316 }
  0xfc   : > { %v363_v6 = vmul.f32 0.03125, %v317_v5 }
  0xfe   : > { %v459_v8 = vmul.f32 %v363_v6, %v363_v6  ;;  %v539_v13 = vsub.f32 %v298_v0, %v363_v6 }
  0xff   : > { %v397_v7 = vpop.xlane.xlu0 %396 }
 0x100   : > { %v443_v9 = vmul.f32 0.03125, %v397_v7 }
 0x102   : > { %v475_v10 = vsub.f32 %v443_v9, %v459_v8 }
 0x104   : > { %v491_v11 = vmax.f32 %v475_v10, 0.0 }
 0x106   : > { %v507_v12 = vadd.f32 1e-05, %v491_v11 }
 0x108   : > { %1248 = vrsqrt.f32 %v507_v12 }
 0x112   : > { %v1249_v14 = vpop.eup %1248 }
 0x113   : > { %v555_v16 = vmul.f32 %v1249_v14, %v539_v13 }
 0x115   : > { %v578_v18 = vmul.f32 %v1144_v15, %v555_v16 }
 0x117   : > { %v601_v19 = vadd.f32 %v1145_v17, %v578_v18 }
 0x119   : > { %1159 = vmatpush3.xpose.msk.msra.mxu0 %vm314_vm0, %v601_v19  ;;  %1164 = vmatpush3.msra.mxu1 %v601_v19 }
 0x11c   : > { %1161 = vmatmul.mubr.msk.f32.vlgmr.msra.gmra.mrb[0].mxu0 %vm314_vm0, %v716_v20 }
 0x1ef   : > { %v834_v24 = vpop.f32.mrb[0].mxu0 }
 0x1f0   : > { %v842_v25 = vsel %vm841_vm3, %v834_v24, -inf  ;;  %v1162_v26 = vpop.f32.mrb[1].mxu0 }
 0x1f1   : > { %v845_v27 = vsel %vm844_vm4, %v842_v25, -inf }
 0x1f2   : > { %846 = vmax.xlane.f32.xlu1 %v845_v27 }
 0x27f   : > { %v847_v30 = vpop.xlane.xlu1 %846 }
 0x280   : > { %v848_v31 = vmax.f32 %v843_v29, %v847_v30 }
 0x282   : > { %v849_v32 = vsub.f32 %v843_v29, %v848_v31  ;;  %948 = vst.msk [vmem:[#allocation3] sm:$0xf] %vm293_vm2, %v848_v31  ;;  %952 = vst.msk [vmem:[#allocation5] sm:$0xf] %vm293_vm2, %v848_v31  ;;  %854 = vperm.xlu1 %1246, %v848_v31  }
 0x284   : > { %v850_v38 = vmul.f32 1.442695, %v849_v32 }
 0x289   : > { %v964_v44 = vld [vmem:[#allocation3] sm:$0xf]  ;;  %v965_v45 = vld [vmem:[#allocation5] sm:$0xf] }
 0x28a   : > { %v966_v46 = vsub.f32 %v965_v45, %v964_v44 }
 0x28c   : > { %v967_v47 = vmul.f32 1.442695, %v966_v46 }
 0x301   : > { %v855_v33 = vpop.permute.xlu1 %854 }
 0x302   : > { %v857_v34 = vsub.f32 %v842_v25, %v855_v33 }
 0x304   : > { %v858_v35 = vmul.f32 1.442695, %v857_v34 }
 0x306   : > { %1250 = vpow2.f32 %v858_v35 }
 0x307   : > { %1252 = vpow2.f32 %v850_v38 }
 0x310   : > { %v1251_v36 = vpop.eup %1250 }
 0x311   : > { %1166 = vmatmul.mubr.f32.vlgmr.msra.gmra.mrb[0].mxu1 %v1251_v36  ;;  %v862_v37 = vsel %vm844_vm4, %v1251_v36, 0.0  ;;  %953 = vst [vmem:[%s1634_s30] sm:$0xf] %v1251_v36  ;;  %v1253_v39 = vpop.eup %1252 }
 0x312   : > { %863 = vadd.xlane.f32.xlu0 %v862_v37  ;;  %v861_v41 = vmul.f32 %v1253_v39, %v860_v40 }
 0x318   : > { %v970_v61 = vld [vmem:[%s1634_s30] sm:$0xf] }
 0x328   : > { %871 = vperm.xlu0 %1247, %v1253_v39  }
 0x39f   : > { %v864_v42 = vpop.xlane.xlu0 %863 }
 0x3a0   : > { %v865_v43 = vadd.f32 %v864_v42, %v861_v41 }
 0x3a2   : > { %867 = vst.msk [vmem:[#allocation4] sm:$0xf] %vm293_vm2, %v865_v43 }
 0x3a7   : > { %v872_v53 = vpop.permute.xlu0 %871 }
 0x3a8   : > { %v874_v54 = vmul.f32 %v872_v53, %v868_v52 }
 0x3a9   : > { %v954_v48 = vld [vmem:[#allocation4] sm:$0xf] }
 0x3aa   : > { %1254 = vrcp.f32 %v954_v48 }
 0x3ab   : > { %1256 = vpow2.f32 %v967_v47 }
 0x3b4   : > { %v1255_v49 = vpop.eup %1254 }
 0x3b5   : > { %959 = vperm.xlu1 %1246, %v1255_v49   ;;  %v1257_v50 = vpop.eup %1256 }
 0x3b6   : > { %v969_v51 = vmul.f32 %v1257_v50, %v1255_v49 }
 0x3b9   : > { %973 = vperm.xlu1 %1246, %v969_v51  }
 0x3e4   : > { %v941_v55 = vpop.f32.mrb[0].mxu1 }
 0x3e5   : > { %v945_v56 = vadd.f32 %v941_v55, %v874_v54  ;;  %v1167_v57 = vpop.f32.mrb[1].mxu1 }
 0x3e7   : > { %947 = vst.msk [vmem:[#allocation2] sm:$0xf] %vm296_vm5, %v945_v56 }
 0x3ee   : > { %v956_v58 = vld [vmem:[#allocation2] sm:$0xf] }
 0x434   : > { %v960_v59 = vpop.permute.xlu1 %959 }
 0x435   : > { %v962_v60 = vmul.f32 %v960_v59, %v956_v58 }
 0x437   : > { %963 = vst.msk [vmem:[%s278_s13] sm:$0xf] %vm296_vm5, %v962_v60 }
 0x438   : > { %v974_v62 = vpop.permute.xlu1 %973 }
 0x439   : > { %1323 = shalt.err (!%p1320_p12)
}
 0x43a   : > { %s1324_s17 = scalar_lea.hbm %s1649_s1, 64  ;;  %s1328_s27 = scalar_lea.hbm %s1739_s4, 128 }
 0x43b   : > { %p1325_p13 = scmp.ne.s32.totalorder %s1649_s1, %s1324_s17  ;;  %p1329_p4 = scmp.lt.u32.totalorder %s1649_s1, %s1739_s4 }
 0x43c   : > { %p1330_p5 = scmp.lt.u32.totalorder %s1328_s27, %s1324_s17  ;;  %p1332_p11 = scmp.lt.u32.totalorder %s1324_s17, %s1649_s1 }
 0x43d   : > { %p1326_p1 = pnand %p1325_p13, %p1759_p9 }
 0x43e   : > { %p1331_p8 = por %p1330_p5, %p1329_p4 }
 0x43f   : > { %p1327_p7 = pneg %p1326_p1 }
 0x440   : > { %p1333_p0 = por %p1332_p11, %p1331_p8 }
 0x442   : > { %p1334_p2 = pnand %p1333_p0, %p1327_p7 }
 0x444   : > { %1337 = shalt.err (!%p1334_p2)
}
 0x445   : > { %1173 = dma.vmem_to_hbm [thread:$0]  (%p1759_p9), %s1651_s12, 64, %s1649_s1, %s979_s15   ;;  %v976_v63 = vmul.f32 %v974_v62, %v970_v61 }
 0x446   : > { %s1683_s10 = scalar_lea.hbm %s1740_s5, %s1150_s24  ;;  %s984_s17 = scalar_lea.sflag [#allocation13], %s1598_s28 }
 0x447   : > { %977 = vst [vmem:[%s1634_s30] sm:$0xf] %v976_v63  ;;  %s1338_s25 = scalar_lea.vmem %s1687_s14, 64  ;;  %s1439_s12 = smov [#allocation12]  }
 0x448   : > { %p1339_p6 = scmp.ne.s32.totalorder %s1687_s14, %s1338_s25  ;;  %s1342_s21 = sshll.u32 %s1439_s12, 4  ;;  %s1343_s21 = int_to_ptr.vmem [resolvable:$false] %s1342_s21 }
 0x449   : > { %s1344_s1 = scalar_lea.vmem %s1343_s21, 128  ;;  %p1345_p13 = scmp.lt.s32.totalorder %s1687_s14, %s1343_s21 }
 0x44a   : > { %p1340_p10 = pnand %p1339_p6, %p1759_p9  ;;  %p1346_p1 = scmp.lt.s32.totalorder %s1344_s1, %s1338_s25 }
 0x44c   : > { %p1341_p12 = pneg %p1340_p10  ;;  %p1347_p7 = por %p1346_p1, %p1345_p13 }
 0x44e   : > { %p1348_p4 = pnand %p1347_p7, %p1341_p12 }
 0x450   : > { %1351 = shalt.err (!%p1348_p4)
}
 0x451   : > { %s1352_s28 = scalar_lea.hbm %s1683_s10, 64  ;;  %s1356_s15 = scalar_lea.hbm %s1740_s5, 128 }
 0x452   : > { %p1353_p5 = scmp.ne.s32.totalorder %s1683_s10, %s1352_s28  ;;  %p1357_p0 = scmp.lt.u32.totalorder %s1683_s10, %s1740_s5 }
 0x453   : > { %p1358_p2 = scmp.lt.u32.totalorder %s1356_s15, %s1352_s28  ;;  %p1360_p10 = scmp.lt.u32.totalorder %s1352_s28, %s1683_s10 }
 0x454   : > { %p1354_p8 = pnand %p1353_p5, %p1759_p9 }
 0x455   : > { %p1359_p6 = por %p1358_p2, %p1357_p0 }
 0x456   : > { %p1355_p11 = pneg %p1354_p8 }
 0x457   : > { %p1361_p12 = por %p1360_p10, %p1359_p6 }
 0x459   : > { %p1362_p13 = pnand %p1361_p12, %p1355_p11 }
 0x45b   : > { %1365 = shalt.err (!%p1362_p13)
}
 0x45c   : > { %1174 = dma.vmem_to_hbm [thread:$0]  (%p1759_p9), %s1687_s14, 64, %s1683_s10, %s984_s17  }
 0x45d PF: > { %s1022_s11 = sand.u32 1, %s1408_s18   ;;  %p1760_p1 = scmp.ne.s32.totalorder %s1751_s9, 0 }
 0x45e   : > { %s1023_s29 = scalar_lea.sflag [#allocation8], %s1022_s11 }
 0x45f   : > { %p1182_p7 = pnand %p1136_p3, %p1760_p1 }
 0x461   : > { %1399 = dma.done.wait (!%p1182_p7), %s1023_s29, 64  }
 0x462   : > { %1401 = vsyncadd (!%p1182_p7), %s1023_s29, 4294967232  ;;  %s1032_s16 = scalar_lea.sflag [#allocation13], %s1022_s11 }
 0x463   : > { %1403 = dma.done.wait (!%p1182_p7), %s1032_s16, 64  }
 0x464   : > { %1405 = vsyncadd (!%p1182_p7), %s1032_s16, 4294967232  ;;  %s26_s23 = sadd.s32 1, %s1428_s23   ;;  %s1761_s18 = smov %s1412_s19 }
 0x465   : > { %p23_p4 = scmp.ge.s32.totalorder %s26_s23, 4   ;;  %s1762_s19 = smov %s1416_s20 }
 0x466   : > { %s1763_s20 = smov %s1532_s8  ;;  %s1764_s21 = smov %s1424_s22 }
 0x467   : > { %s1765_s22 = smov %s1767_s26  ;;  %25 = sbr.rel (!%p23_p4) target bundleno = 11 (0xb), region = 110 }
 0x46e   :  { %1037 = vsyncpa [#allocation7], 1 }
 0x46f   :  { %1039 = vsyncpa [#allocation7 + $0x1], 1 }
 0x470   :  { %1040 = vsyncpa [#allocation10], 1 }
 0x471   :  { %1041 = vsyncpa [#allocation8], 1 }
 0x472   :  { %1043 = vsyncpa [#allocation8 + $0x1], 1 }
 0x473   :  { %1044 = vsyncpa [#allocation13], 1 }
 0x474   :  { %1046 = vsyncpa [#allocation13 + $0x1], 1 }

</bundles_post_ra>
